<compile_context>
chip_gen: v7x
topology: tpu7x:2x2x1
jax: 0.10.0
libtpu: 0.0.40
codegen_flags: <defaults>
</compile_context>

<pallas_src>
import numpy as np
import jax
import jax.numpy as jnp
from jax.experimental import pallas as pl
from jax.experimental.pallas import tpu as pltpu


# ----------------------------------------------------------------------------
# Host-side glue: bilinear interpolation matrices (align_corners=False, no AA),
# matching PyTorch's upsample_bilinear2d source-index computation.
# ----------------------------------------------------------------------------
def _bilinear_resize_matrix(in_size: int, out_size: int) -> np.ndarray:
    scale = in_size / out_size
    dst = np.arange(out_size, dtype=np.float64)
    src = (dst + 0.5) * scale - 0.5
    src = np.maximum(src, 0.0)                       # PyTorch clamps negatives
    lo = np.floor(src).astype(np.int64)
    lo = np.minimum(lo, in_size - 1)
    hi = np.minimum(lo + 1, in_size - 1)
    w_hi = src - lo
    w_lo = 1.0 - w_hi
    W = np.zeros((out_size, in_size), dtype=np.float64)
    W[np.arange(out_size), lo] += w_lo
    W[np.arange(out_size), hi] += w_hi
    return W.astype(np.float32)


def _resized_output_size(h: int, w: int, size: int):
    # torchvision _compute_resized_output_size with a single int size
    short, long = (w, h) if w <= h else (h, w)
    if short == size:
        return h, w
    new_short, new_long = size, int(size * long / short)
    new_w, new_h = (new_short, new_long) if w <= h else (new_long, new_short)
    return new_h, new_w


# ----------------------------------------------------------------------------
# Pallas kernel: one (batch, channel) plane per grid step.
#   out[b, c] = (Wy_c @ x[b, c] @ Wx_c^T) * scale[c] + shift[c]
# Contraction order chosen statically; the intermediate lives in VMEM scratch.
# ----------------------------------------------------------------------------
def _make_kernel(h_first: bool, precision):
    if h_first:
        # (crop, H) @ (H, W) -> scratch (crop, W); then (crop, W) @ (W, crop)
        def kernel(scale_ref, shift_ref, x_ref, wy_ref, wxt_ref, o_ref, tmp_ref):
            c = pl.program_id(1)
            tmp_ref[...] = jnp.dot(wy_ref[...], x_ref[...],
                                   preferred_element_type=jnp.float32,
                                   precision=precision)
            r = jnp.dot(tmp_ref[...], wxt_ref[...],
                        preferred_element_type=jnp.float32,
                        precision=precision)
            o_ref[...] = (r * scale_ref[c] + shift_ref[c]).astype(o_ref.dtype)
    else:
        # (H, W) @ (W, crop) -> scratch (H, crop); then (crop, H) @ (H, crop)
        def kernel(scale_ref, shift_ref, x_ref, wy_ref, wxt_ref, o_ref, tmp_ref):
            c = pl.program_id(1)
            tmp_ref[...] = jnp.dot(x_ref[...], wxt_ref[...],
                                   preferred_element_type=jnp.float32,
                                   precision=precision)
            r = jnp.dot(wy_ref[...], tmp_ref[...],
                        preferred_element_type=jnp.float32,
                        precision=precision)
            o_ref[...] = (r * scale_ref[c] + shift_ref[c]).astype(o_ref.dtype)
    return kernel


# ----------------------------------------------------------------------------
# Wrapper
# ----------------------------------------------------------------------------
def image_classification_forward(x,
                                 crop_size: int,
                                 resize_size: int = 256,
                                 mean=(0.485, 0.456, 0.406),
                                 std=(0.229, 0.224, 0.225),
                                 precision=jax.lax.Precision.HIGHEST,
                                 out_dtype=jnp.float32):
    # TODO(synk): convert_image_dtype for integer inputs (uint8 -> /255) is not
    # implemented; callers must pass float images already scaled to [0, 1].
    x = x.astype(jnp.float32)
    B, C, H, W = x.shape
    assert len(mean) == C and len(std) == C
    new_h, new_w = _resized_output_size(H, W, resize_size)

    # Separable bilinear resize matrices (antialias=False / legacy 'warn').
    # TODO(synk): antialias=True (wider row support) not implemented.
    Wy = _bilinear_resize_matrix(H, new_h)                    # (new_h, H)
    Wx = _bilinear_resize_matrix(W, new_w)                    # (new_w, W)

    # Center crop folded in by slicing interpolation-matrix rows.
    crop_top = int(round((new_h - crop_size) / 2.0))
    crop_left = int(round((new_w - crop_size) / 2.0))
    # TODO(synk): torchvision pads when the resized image is smaller than the
    # crop; not implemented here (standard configs have resize >= crop).
    assert crop_top >= 0 and crop_left >= 0

    Wy_c = np.ascontiguousarray(Wy[crop_top:crop_top + crop_size])        # (crop, H)
    WxT_c = np.ascontiguousarray(Wx[crop_left:crop_left + crop_size].T)   # (W, crop)

    # Per-channel affine folded host-side: out = resized * scale + shift.
    scale = (1.0 / np.asarray(std, np.float64)).astype(np.float32)
    shift = (-np.asarray(mean, np.float64)
             / np.asarray(std, np.float64)).astype(np.float32)

    # Contract the longer input edge first: fewer FLOPs, smaller scratch.
    h_first = H >= W
    tmp_shape = (crop_size, W) if h_first else (H, crop_size)
    kernel = _make_kernel(h_first, precision)

    # Advisory cost estimate (whole call).
    if h_first:
        flops = 2 * B * C * crop_size * W * (H + crop_size)
    else:
        flops = 2 * B * C * crop_size * H * (W + crop_size)
    bytes_accessed = 4 * (B * C * H * W                       # input
                          + crop_size * H + W * crop_size     # weights
                          + 2 * C)                            # scale/shift
    bytes_accessed += B * C * crop_size * crop_size * jnp.dtype(out_dtype).itemsize

    # Explicit VMEM budget from the actual per-step blocks (double-buffered by
    # the pipeline) + scratch + headroom.
    # TODO(synk): for very large frames (e.g. f32 4K on v7x's 64 MiB VMEM) add
    # an H-tiled reduction grid axis; standard preset sizes fit comfortably.
    block_bytes = 4 * (2 * H * W
                       + 2 * crop_size * crop_size
                       + 2 * crop_size * H
                       + 2 * W * crop_size
                       + tmp_shape[0] * tmp_shape[1])
    vmem_limit = int(min(max(block_bytes + (8 << 20), 32 << 20), 120 << 20))

    # Note: Wy_c / WxT_c block indices never change across the grid, so the
    # pipeline fetches them once; single-buffering them (pl.Buffered(1)) would
    # save a little more VMEM but is left at the default for robustness.
    out = pl.pallas_call(
        kernel,
        out_shape=jax.ShapeDtypeStruct((B, C, crop_size, crop_size), out_dtype),
        grid=(B, C),
        in_specs=[
            pl.BlockSpec(memory_space=pltpu.MemorySpace.SMEM),    # scale (C,)
            pl.BlockSpec(memory_space=pltpu.MemorySpace.SMEM),    # shift (C,)
            pl.BlockSpec((None, None, H, W), lambda b, c: (b, c, 0, 0)),
            pl.BlockSpec((crop_size, H), lambda b, c: (0, 0)),
            pl.BlockSpec((W, crop_size), lambda b, c: (0, 0)),
        ],
        out_specs=pl.BlockSpec((None, None, crop_size, crop_size),
                               lambda b, c: (b, c, 0, 0)),
        scratch_shapes=[pltpu.VMEM(tmp_shape, jnp.float32)],
        compiler_params=pltpu.CompilerParams(
            dimension_semantics=("parallel", "parallel"),
            vmem_limit_bytes=vmem_limit),
        cost_estimate=pl.CostEstimate(flops=int(flops), transcendentals=0,
                                      bytes_accessed=int(bytes_accessed)),
    )(jnp.asarray(scale), jnp.asarray(shift), x,
      jnp.asarray(Wy_c), jnp.asarray(WxT_c))
    return out


# ----------------------------------------------------------------------------
# Test
# ----------------------------------------------------------------------------
if __name__ == "__main__":
    key = jax.random.PRNGKey(0)
    mean = (0.485, 0.456, 0.406)
    std = (0.229, 0.224, 0.225)
    crop_size, resize_size = 4, 8

    def reference(x, crop, rsize):
        _, _, H, W = x.shape
        nh, nw = _resized_output_size(H, W, rsize)
        Wy = _bilinear_resize_matrix(H, nh)
        Wx = _bilinear_resize_matrix(W, nw)
        top = int(round((nh - crop) / 2.0))
        left = int(round((nw - crop) / 2.0))
        Wy_c = jnp.asarray(Wy[top:top + crop])
        Wx_c = jnp.asarray(Wx[left:left + crop])
        m = jnp.asarray(mean, jnp.float32).reshape(1, 3, 1, 1)
        s = jnp.asarray(std, jnp.float32).reshape(1, 3, 1, 1)
        resized = jnp.einsum("oh,bchw,pw->bcop", Wy_c, x, Wx_c,
                             precision=jax.lax.Precision.HIGHEST)
        return (resized - m) / s

    # Two aspect ratios so both contraction-order paths are exercised.
    for (H, W) in [(16, 20), (20, 16)]:
        x = jax.random.uniform(key, (2, 3, H, W), dtype=jnp.float32)
        out = image_classification_forward(x, crop_size=crop_size,
                                           resize_size=resize_size,
                                           mean=mean, std=std)
        jax.block_until_ready(out)
        assert out.shape == (2, 3, crop_size, crop_size)
        ref = reference(x, crop_size, resize_size)
        np.testing.assert_allclose(np.asarray(out), np.asarray(ref),
                                   rtol=1e-5, atol=1e-5)

    print("KERNEL_OK")
</pallas_src>

<mosaic_0001>
module attributes {stable_mosaic.version = 11 : i64} {
  func.func @kernel(%arg0: i32, %arg1: i32, %arg2: memref<3xf32, #tpu.memory_space<smem>>, %arg3: memref<3xf32, #tpu.memory_space<smem>>, %arg4: memref<1x1x16x20xf32, #tpu.memory_space<vmem>>, %arg5: memref<4x16xf32, #tpu.memory_space<vmem>>, %arg6: memref<20x4xf32, #tpu.memory_space<vmem>>, %arg7: memref<1x1x4x4xf32, #tpu.memory_space<vmem>>, %arg8: memref<16x4xf32, #tpu.memory_space<vmem>>) attributes {dimension_semantics = [#tpu.dimension_semantics<parallel>, #tpu.dimension_semantics<parallel>], iteration_bounds = array<i64: 2, 3>, scalar_prefetch = 0 : i64, scratch_operands = 1 : i64, tpu.core_type = #tpu.core_type<tc>, window_params = [{transform_indices = @transform_0, window_bounds = array<i64: 3>}, {transform_indices = @transform_1, window_bounds = array<i64: 3>}, {transform_indices = @transform_2, window_bounds = array<i64: 1, 1, 16, 20>}, {pipeline_mode = #tpu.pipeline_mode<synchronous>, transform_indices = @transform_3, window_bounds = array<i64: 4, 16>}, {pipeline_mode = #tpu.pipeline_mode<synchronous>, transform_indices = @transform_4, window_bounds = array<i64: 20, 4>}, {transform_indices = @transform_5, window_bounds = array<i64: 1, 1, 4, 4>}]} {
    %c0 = arith.constant 0 : index
    %c0_0 = arith.constant 0 : index
    %c0_1 = arith.constant 0 : index
    %c0_2 = arith.constant 0 : index
    %0 = vector.load %arg4[%c0, %c0_0, %c0_1, %c0_2] : memref<1x1x16x20xf32, #tpu.memory_space<vmem>>, vector<1x1x16x20xf32>
    %1 = vector.shape_cast %0 : vector<1x1x16x20xf32> to vector<16x20xf32>
    %c0_3 = arith.constant 0 : index
    %c0_4 = arith.constant 0 : index
    %2 = vector.load %arg6[%c0_3, %c0_4] : memref<20x4xf32, #tpu.memory_space<vmem>>, vector<20x4xf32>
    %cst = arith.constant dense<0.000000e+00> : vector<16x4xf32>
    %3 = tpu.matmul %1, %2, %cst {dimension_numbers = #tpu.dot_dimension_numbers<[1], [0], [0], [1], [0, 0, 1, 1], [], []>, precision = #tpu.contract_precision<fp32>} : vector<16x20xf32>, vector<20x4xf32>, vector<16x4xf32> -> vector<16x4xf32>
    %c0_5 = arith.constant 0 : index
    %c0_6 = arith.constant 0 : index
    %4 = vector.load %arg8[%c0_5, %c0_6] : memref<16x4xf32, #tpu.memory_space<vmem>>, vector<16x4xf32>
    tpu.vector_store %arg8[%c0_5, %c0_6], %3 {strides = array<i32>} : memref<16x4xf32, #tpu.memory_space<vmem>>, vector<16x4xf32>,
    %c0_7 = arith.constant 0 : index
    %c0_8 = arith.constant 0 : index
    %5 = vector.load %arg5[%c0_7, %c0_8] : memref<4x16xf32, #tpu.memory_space<vmem>>, vector<4x16xf32>
    %c0_9 = arith.constant 0 : index
    %c0_10 = arith.constant 0 : index
    %6 = vector.load %arg8[%c0_9, %c0_10] : memref<16x4xf32, #tpu.memory_space<vmem>>, vector<16x4xf32>
    %cst_11 = arith.constant dense<0.000000e+00> : vector<4x4xf32>
    %7 = tpu.matmul %5, %6, %cst_11 {dimension_numbers = #tpu.dot_dimension_numbers<[1], [0], [0], [1], [0, 0, 1, 1], [], []>, precision = #tpu.contract_precision<fp32>} : vector<4x16xf32>, vector<16x4xf32>, vector<4x4xf32> -> vector<4x4xf32>
    %8 = arith.index_cast %arg1 : i32 to index
    %9 = memref.load %arg2[%8] : memref<3xf32, #tpu.memory_space<smem>>
    %10 = vector.broadcast %9 : f32 to vector<4x4xf32>
    %11 = arith.mulf %7, %10 : vector<4x4xf32>
    %12 = arith.index_cast %arg1 : i32 to index
    %13 = memref.load %arg3[%12] : memref<3xf32, #tpu.memory_space<smem>>
    %14 = vector.broadcast %13 : f32 to vector<4x4xf32>
    %15 = arith.addf %11, %14 : vector<4x4xf32>
    %c0_12 = arith.constant 0 : index
    %c0_13 = arith.constant 0 : index
    %c0_14 = arith.constant 0 : index
    %c0_15 = arith.constant 0 : index
    %16 = vector.load %arg7[%c0_12, %c0_13, %c0_14, %c0_15] : memref<1x1x4x4xf32, #tpu.memory_space<vmem>>, vector<1x1x4x4xf32>
    %17 = vector.shape_cast %16 : vector<1x1x4x4xf32> to vector<4x4xf32>
    %18 = vector.shape_cast %15 : vector<4x4xf32> to vector<1x1x4x4xf32>
    tpu.vector_store %arg7[%c0_12, %c0_13, %c0_14, %c0_15], %18 {strides = array<i32>} : memref<1x1x4x4xf32, #tpu.memory_space<vmem>>, vector<1x1x4x4xf32>,
    return
  }
  func.func @transform_0(%arg0: i32, %arg1: i32) -> i32 {
    %c0_i32 = arith.constant 0 : i32
    %c0_i32_0 = arith.constant 0 : i32
    return %c0_i32 : i32
  }
  func.func @transform_1(%arg0: i32, %arg1: i32) -> i32 {
    %c0_i32 = arith.constant 0 : i32
    %c0_i32_0 = arith.constant 0 : i32
    return %c0_i32 : i32
  }
  func.func @transform_2(%arg0: i32, %arg1: i32) -> (i32, i32, i32, i32) {
    %c0_i32 = arith.constant 0 : i32
    %c0_i32_0 = arith.constant 0 : i32
    %c0_i32_1 = arith.constant 0 : i32
    return %arg0, %arg1, %c0_i32, %c0_i32_0 : i32, i32, i32, i32
  }
  func.func @transform_3(%arg0: i32, %arg1: i32) -> (i32, i32) {
    %c0_i32 = arith.constant 0 : i32
    %c0_i32_0 = arith.constant 0 : i32
    %c0_i32_1 = arith.constant 0 : i32
    return %c0_i32, %c0_i32_0 : i32, i32
  }
  func.func @transform_4(%arg0: i32, %arg1: i32) -> (i32, i32) {
    %c0_i32 = arith.constant 0 : i32
    %c0_i32_0 = arith.constant 0 : i32
    %c0_i32_1 = arith.constant 0 : i32
    return %c0_i32, %c0_i32_0 : i32, i32
  }
  func.func @transform_5(%arg0: i32, %arg1: i32) -> (i32, i32, i32, i32) {
    %c0_i32 = arith.constant 0 : i32
    %c0_i32_0 = arith.constant 0 : i32
    %c0_i32_1 = arith.constant 0 : i32
    return %arg0, %arg1, %c0_i32, %c0_i32_0 : i32, i32, i32, i32
  }
}

</mosaic_0001>

<bundles_post_ra>
// kernel: tpu_custom_call.1
= control target key start
LH: loop header
LB: loop body
LE: loop exit
PB: predicated region body
PF: predicated region fallthrough
CT: control target
= control target key end

     0   :  { %s2213_s0 = inlined_call_operand.vmem [shape: f32[3], index: 0, kind: input, shape index: {}]   ;;  %s2214_s1 = inlined_call_operand.vmem [shape: f32[3], index: 1, kind: input, shape index: {}]   ;;  %s2215_s2 = inlined_call_operand.hbm [shape: f32[2,3,16,20], index: 2, kind: input, shape index: {}]   ;;  %s2216_s3 = inlined_call_operand.vmem [shape: f32[4,16], index: 3, kind: input, shape index: {}]   ;;  %s2217_s4 = inlined_call_operand.vmem [shape: f32[20,4], index: 4, kind: input, shape index: {}]   ;;  %s2218_s5 = inlined_call_operand.hbm [shape: f32[2,3,4,4], index: 5, kind: output, shape index: {}]  }
   0x1   :  { %2229 = sst [smem:[#allocation19_spill]] %s2213_s0 }
   0x2   :  { %2230 = sst [smem:[#allocation20_spill]] %s2214_s1 }
   0x3   :  { %10 = vsyncpa [#allocation6], 0 }
   0x4   :  { %11 = vsyncpa [#allocation8], 0 }
   0x5   :  { %12 = vsyncpa [#allocation4], 0 }
   0x6   :  { %14 = vsyncpa [#allocation4 + $0x1], 0 }
   0x7   :  { %15 = vsyncpa [#allocation5], 0 }
   0x8   :  { %17 = vsyncpa [#allocation5 + $0x1], 0  ;;  %s1957_s18 = smov 0   ;;  %s1959_s19 = smov 0  }
   0x9   :  { %s1961_s20 = smov 0   ;;  %s1963_s21 = smov 0  }
   0xa   :  { %s1965_s22 = smov 0   ;;  %s1967_s23 = smov 0  }
   0xb   :  { %s1969_s24 = smov 0   ;;  %s1971_s25 = smov 0  }
   0xc LB: > { %2231 = sst [smem:[#allocation15_spill]] %s1888_s18  ;;  %s1420_s26 = sadd.s32 4294967295, %s1916_s25   ;;  %s1916_s25 = sphi %s1971_s25, %s23_s25   ;;  %s1912_s24 = sphi %s1969_s24, %s2260_s24   ;;  %s1908_s23 = sphi %s1967_s23, %s2255_s23   ;;  %s1904_s22 = sphi %s1965_s22, %s2259_s22   ;;  %s1900_s21 = sphi %s1963_s21, %s2254_s21   ;;  %s1896_s20 = sphi %s1961_s20, %s2258_s20   ;;  %s1892_s19 = sphi %s1959_s19, %s2257_s19   ;;  %s1888_s18 = sphi %s1957_s18, %s2256_s18  }
   0xd   : > { %2232 = sst [smem:[#allocation16_spill]] %s1908_s23  ;;  %s1421_s27 = sadd.s32 4294967294, %s1916_s25  }
   0xe   : > { %p93_p0 = scmp.ne.s32.totalorder %s1896_s20, %s1892_s19  ;;  %p94_p1 = scmp.eq.s32.totalorder %s1916_s25, 0 }
   0xf   : > { %p99_p2 = scmp.ne.s32.totalorder %s1892_s19, %s1888_s18  ;;  %p2005_p3 = scmp.eq.s32.totalorder %s1420_s26, 0 }
  0x10   : > { %p167_p4 = scmp.eq.s32.totalorder %s1420_s26, 5  ;;  %p2009_p5 = por %p94_p1, %p93_p0 }
  0x11   : > { %s2233_s29 = scalar_select %p2005_p3, 1, 0 }
  0x12   : > { %p173_p6 = scmp.eq.s32.totalorder %s1421_s27, 5  ;;  %p2015_p7 = por %p2005_p3, %p99_p2 }
  0x13   : > { %p2019_p8 = por %p167_p4, %p93_p0  ;;  %p1422_p10 = scmp.ge.s32.totalorder %s1916_s25, 1 }
  0x14   : > { %s2235_s6 = scalar_select %p2015_p7, 1, 0 }
  0x15   : > { %s2236_s7 = scalar_select %p2019_p8, 1, 0 }
  0x16   : > { %p2023_p9 = por %p173_p6, %p99_p2  ;;  %p180_p11 = scmp.lt.s32.totalorder %s1916_s25, 7 }
  0x17   : > { %s2239_s0 = sld [smem:[#allocation19_spill]]  ;;  %p1675_p13 = scmp.lt.s32.totalorder %s1916_s25, 6 }
  0x18   : > { %s2237_s8 = scalar_select %p2023_p9, 1, 0 }
  0x19   : > { %p2032_p12 = pnand %p1422_p10, %p180_p11  ;;  %s2241_s1 = sld [smem:[#allocation20_spill]] }
  0x1a   : > { %2238 = sst [smem:[#allocation17_spill]] %s2237_s8  ;;  %p2044_p1 = pnand %p1675_p13, %p2009_p5 }
  0x1b   : > { %s2240_s12 = scalar_select %p2032_p12, 1, 0 }
  0x1c   : > { %p1658_p0 = pneg %p2032_p12 }
  0x1d   : > { %s193_s11 = sshll.u32 %s2239_s0, 4  ;;  %s194_s11 = int_to_ptr.vmem [resolvable:$true] %s193_s11 }
  0x1e   : > { %s2242_s16 = scalar_select %p2044_p1, 1, 0 }
  0x1f   : > { %s204_s15 = sshll.u32 %s2241_s1, 4  ;;  %p2050_p2 = pnand %p1658_p0, %p2005_p3  ;;  %s205_s15 = int_to_ptr.vmem [resolvable:$true] %s204_s15 }
  0x20   : > { %s1750_s26 = scalar_lea.vmem %s194_s11, 16  ;;  %p1758_p9 = scmp.lt.s32.totalorder %s194_s11, %s194_s11 }
  0x21   : > { %p1751_p4 = scmp.ne.s32.totalorder %s194_s11, %s1750_s26  ;;  %p1752_p6 = pneg %p2050_p2 }
  0x22   : > { %p1759_p8 = scmp.lt.s32.totalorder %s1750_s26, %s1750_s26 }
  0x23   : > { %p1753_p10 = pnand %p1752_p6, %p1751_p4 }
  0x24   : > { %p1760_p7 = por %p1759_p8, %p1758_p9 }
  0x25   : > { %p1754_p11 = pneg %p1753_p10 }
  0x27   : > { %p1761_p5 = pnand %p1760_p7, %p1754_p11 }
  0x29   : > { %1764 = shalt.err (!%p1761_p5)
}
  0x2a   : > { %s1918_s27 = smov [#allocation3]   ;;  %s1765_s30 = scalar_lea.vmem %s205_s15, 16 }
  0x2b   : > { %1661 = dma.vmem_to_smem (!%p2050_p2), %s194_s11, 16, %s1918_s27, [#allocation6]  }
  0x2c   : > { %p1766_p13 = scmp.ne.s32.totalorder %s205_s15, %s1765_s30  ;;  %p1773_p12 = scmp.lt.s32.totalorder %s205_s15, %s205_s15 }
  0x2d   : > { %p1774_p1 = scmp.lt.s32.totalorder %s1765_s30, %s1765_s30 }
  0x2e   : > { %p1768_p0 = pnand %p1766_p13, %p1752_p6 }
  0x2f   : > { %p1775_p4 = por %p1774_p1, %p1773_p12 }
  0x30   : > { %p1769_p3 = pneg %p1768_p0 }
  0x32   : > { %p1776_p10 = pnand %p1775_p4, %p1769_p3 }
  0x34   : > { %1779 = shalt.err (!%p1776_p10)
}
  0x35   : > { %s1919_s9 = smov [#allocation7]   ;;  %s32_s10 = sadd.s32 1, %s1908_s23 }
  0x36   : > { %1664 = dma.vmem_to_smem (!%p2050_p2), %s205_s15, 16, %s1919_s9, [#allocation8]  }
  0x37   : > { %s35_s11 = sadd.s32 1, %s1912_s24  ;;  %p33_p7 = scmp.ge.s32.totalorder %s32_s10, 3 }
  0x38   : > { %s221_s13 = sand.u32 1, %s1896_s20   ;;  %s1427_s26 = sshll.u32 %s1908_s23, 1 }
  0x39   : > { %s1426_s14 = sshll.u32 %s221_s13, 4  ;;  %s2262_s10 = smov (%p33_p7, %s32_s10), 0 }
  0x3a   : > { %2244 = sst [smem:[#allocation18_spill]] %s2262_s10  ;;  %s2264_s11 = smov (!%p33_p7, %s35_s11), %s1912_s24 }
  0x3b   : > { %s82_s17 = ssub.s32 %s1908_s23, %s2262_s10  ;;  %p37_p3 = scmp.ge.s32.totalorder %s2264_s11, 2 }
  0x3c   : > { %s1644_s27 = smul.u32 6, %s1912_s24  ;;  %s225_s30 = scalar_lea.vmem [#allocation9], %s1426_s14 }
  0x3d   : > { %s234_s15 = sshll.u32 %s225_s30, 4  ;;  %s2266_s11 = smov (%p37_p3, %s2264_s11), 0  ;;  %s2072_s15 = int_to_ptr.vmem [resolvable:$true] %s234_s15 }
  0x3e   : > { %s231_s9 = sadd.s32 %s1644_s27, %s1427_s26  ;;  %s81_s28 = ssub.s32 %s1912_s24, %s2266_s11 }
  0x3f   : > { %s1428_s0 = sshll.u32 %s231_s9, 7  ;;  %s83_s1 = sor.u32 %s82_s17, %s81_s28 }
  0x40   : > { %s2079_s10 = scalar_lea.hbm %s2215_s2, %s1428_s0  ;;  %p84_p8 = scmp.eq.s32.totalorder %s83_s1, 0 }
  0x41   : > { %s2245_s14 = sadd.s32 1, %s1896_s20  ;;  %s2086_s23 = scalar_lea.sflag [#allocation4], %s221_s13 }
  0x42   : > { %s2084_s30 = scalar_select %p84_p8, %s1896_s20, %s2245_s14  }
  0x43   : > { %s1780_s26 = scalar_lea.hbm %s2079_s10, 256  ;;  %p2246_p12 = scmp.ne.s32.totalorder %s2242_s16, 0 }
  0x44   : > { %p1781_p9 = scmp.ne.s32.totalorder %s2079_s10, %s1780_s26  ;;  %s1785_s28 = scalar_lea.hbm %s2215_s2, 1536 }
  0x45   : > { %p1782_p1 = pneg %p2246_p12  ;;  %p1786_p11 = scmp.lt.u32.totalorder %s2079_s10, %s2215_s2 }
  0x46   : > { %p1787_p5 = scmp.lt.u32.totalorder %s1785_s28, %s1780_s26  ;;  %p1789_p0 = scmp.lt.u32.totalorder %s1780_s26, %s2079_s10 }
  0x47   : > { %p1783_p2 = pnand %p1782_p1, %p1781_p9 }
  0x48   : > { %p1788_p13 = por %p1787_p5, %p1786_p11 }
  0x49   : > { %p1784_p6 = pneg %p1783_p2 }
  0x4a   : > { %p1790_p4 = por %p1789_p0, %p1788_p13 }
  0x4c   : > { %p1791_p10 = pnand %p1790_p4, %p1784_p6 }
  0x4e   : > { %1794 = shalt.err (!%p1791_p10)
}
  0x4f   : > { %s1795_s1 = scalar_lea.vmem %s2072_s15, 256  ;;  %s1920_s13 = smov [#allocation9]  }
  0x50   : > { %p1796_p7 = scmp.ne.s32.totalorder %s2072_s15, %s1795_s1  ;;  %s1800_s27 = sshll.u32 %s1920_s13, 4  ;;  %s1801_s27 = int_to_ptr.vmem [resolvable:$false] %s1800_s27 }
  0x51   : > { %s1802_s9 = scalar_lea.vmem %s1801_s27, 512  ;;  %p1803_p9 = scmp.lt.s32.totalorder %s2072_s15, %s1801_s27 }
  0x52   : > { %p1798_p3 = pnand %p1796_p7, %p1782_p1  ;;  %p1804_p2 = scmp.lt.s32.totalorder %s1802_s9, %s1795_s1 }
  0x54   : > { %p1799_p8 = pneg %p1798_p3  ;;  %p1805_p11 = por %p1804_p2, %p1803_p9 }
  0x56   : > { %p1806_p5 = pnand %p1805_p11, %p1799_p8 }
  0x58   : > { %1809 = shalt.err (!%p1806_p5)
}
  0x59   : > { %s1921_s14 = smov 128   ;;  %s1922_s26 = smov 8  }
  0x5a   : > { %1668 = dma.hbm_to_vmem [thread:$0]  (!%p2246_p12), %s2079_s10, 256, %s2072_s15, %s2086_s23, %s1921_s14, %s1921_s14, %s1922_s26  }
  0x5b   : > { %p2247_p1 = scmp.ne.s32.totalorder %s2240_s12, 0 }
  0x5c   : > { %p2248_p6 = scmp.ne.s32.totalorder (!%p2247_p1), %s2233_s29, 0 }
  0x5d   : > { %246 = sbr.rel (%p2247_p1) target bundleno = 660 (0x294), region = 40 }
  0x64   : > { %1871 = dma.done.wait (%p2248_p6), [#allocation6], 16  }
  0x65   : > { %1873 = vsyncadd (%p2248_p6), [#allocation6], 4294967280 }
  0x66   : > { %1875 = dma.done.wait (%p2248_p6), [#allocation8], 16  }
  0x67   : > { %1877 = vsyncadd (%p2248_p6), [#allocation8], 4294967280  ;;  %s2125_s0 = sand.u32 1, %s1892_s19   ;;  %p2249_p12 = scmp.ne.s32.totalorder %s2235_s6, 0 }
  0x68   : > { %s1432_s23 = sshll.u32 %s2125_s0, 4  ;;  %s257_s12 = scalar_lea.sflag [#allocation4], %s2125_s0 }
  0x69   : > { %s260_s16 = scalar_lea.vmem [#allocation9], %s1432_s23 }
  0x6a   : > { %1879 = dma.done.wait (%p2249_p12), %s257_s12, 256  }
  0x6b   : > { %1881 = vsyncadd (%p2249_p12), %s257_s12, 4294967040 }
  0x6c   : > { %265 = sfence }
  0x6d   : > { %v290_v0 = vld [vmem:[%s2217_s4] sm:$0xff]  ;;  %v291_v1 = vld [vmem:[%s2217_s4 + $0x8] sm:$0xff]  ;;  %v292_v2 = vld [vmem:[%s2217_s4 + $0x10] sm:$0xf]  ;;  %vm300_vm0 = vcmask 1043456   ;;  %vm293_vm1 = vcmask 162816  }
  0x6e   : > { %v305_v3 = vand.u32 4294901760, %v290_v0  ;;  %v308_v4 = vand.u32 4294901760, %v291_v1  ;;  %v302_v5 = vsel %vm300_vm0, %v292_v2, 0  ;;  %v288_v6 = vld [vmem:[%s260_s16] sm:$0xff]  ;;  %v289_v7 = vld [vmem:[%s260_s16 + $0x8] sm:$0xff]  ;;  %v1923_v37 = vmov 0.0|0.0  }
  0x6f   : > { %v311_v8 = vand.u32 4294901760, %v302_v5  ;;  %v295_v9 = vsel %vm293_vm1, %v288_v6, 0  ;;  %v298_v10 = vsel %vm293_vm1, %v289_v7, 0  ;;  %vm1924_vm2 = vmmov 0   ;;  %v822_v41 = vld [vmem:[%s2216_s3] sm:$0xf] }
  0x70   : > { %v1582_v11 = vpack.c.bf16 %v308_v4, %v305_v3  ;;  %v394_v12 = vsub.f32 %v290_v0, %v305_v3  ;;  %v401_v13 = vsub.f32 %v291_v1, %v308_v4  ;;  %v372_v14 = vand.u32 4294901760, %v295_v9  ;;  %s1288_s1 = sld [smem:[#allocation3 + %s1900_s21]]  ;;  %s1645_s27 = smul.u32 3, %s1904_s22 }
  0x71   : > { %v408_v15 = vsub.f32 %v302_v5, %v311_v8  ;;  %v382_v16 = vand.u32 4294901760, %v298_v10  ;;  %v1925_v38 = vmov 0.0   ;;  %vm825_vm3 = vcmask 130048   ;;  %s1291_s13 = sld [smem:[#allocation7 + %s1900_s21]]  ;;  %s1433_s9 = sshll.u32 %s2125_s0, 2 }
  0x72   : > { %v395_v17 = vand.u32 4294901760, %v394_v12  ;;  %v402_v18 = vand.u32 4294901760, %v401_v13  ;;  %1501 = vmatprep.mubr.f32.mxu0 %v372_v14  ;;  %v373_v19 = vsub.f32 %v295_v9, %v372_v14  ;;  %1583 = vmatprep.subr.bf16.mxu1 %v1582_v11  ;;  %v1590_v35 = vpack.c.bf16 %v401_v13, %v394_v12  ;;  %s1308_s14 = sadd.s32 %s1900_s21, %s1645_s27  ;;  %s287_s23 = scalar_lea.vmem [#allocation10], %s1433_s9 }
  0x73   : > { %v409_v20 = vand.u32 4294901760, %v408_v15  ;;  %v383_v21 = vsub.f32 %v298_v10, %v382_v16  ;;  %1585 = vmatpush3.bf16.msra.mxu1 %v1582_v11  ;;  %v827_v42 = vsel %vm825_vm3, %v822_v41, 0  ;;  %vm819_vm4 = vcmask 31744   ;;  %s1435_s26 = sshll.u32 %s1308_s14, 6  ;;  %s1312_s12 = sshll.u32 %s287_s23, 4  ;;  %s2161_s12 = int_to_ptr.vmem [resolvable:$true] %s1312_s12 }
  0x74   : > { %v396_v22 = vsub.f32 %v394_v12, %v395_v17  ;;  %v403_v23 = vsub.f32 %v401_v13, %v402_v18  ;;  %v374_v24 = vand.u32 4294901760, %v373_v19  ;;  %1490 = vmatprep.subr.mxu1 %v311_v8  ;;  %v1598_v36 = vpack.c.bf16 %v402_v18, %v395_v17  ;;  %s2159_s15 = scalar_lea.hbm %s2218_s5, %s1435_s26  ;;  %s1297_s21 = scalar_lea.sflag [#allocation5], %s2125_s0 }
  0x75   : > { %v410_v25 = vsub.f32 %v408_v15, %v409_v20  ;;  %v384_v26 = vand.u32 4294901760, %v383_v21  ;;  %v896_v43 = vand.u32 4294901760, %v827_v42  ;;  %vm1294_vm5 = vcmask 27648   ;;  %s1810_s22 = scalar_lea.vmem %s2161_s12, 64  ;;  %p2250_p0 = scmp.ne.s32.totalorder %s2236_s7, 0 }
  0x76   : > { %v397_v27 = vand.u32 4294901760, %v396_v22  ;;  %v404_v28 = vand.u32 4294901760, %v403_v23  ;;  %v375_v29 = vsub.f32 %v373_v19, %v374_v24  ;;  %v1289_v4 = vstv %s1288_s1  ;;  %p1811_p13 = scmp.ne.s32.totalorder %s2161_s12, %s1810_s22  ;;  %s1926_s29 = smov [#allocation10]  }
  0x77   : > { %1491 = vmatpush3.msra.mxu1 %v311_v8  ;;  %v385_v30 = vsub.f32 %v383_v21, %v384_v26  ;;  %v411_v32 = vand.u32 4294901760, %v410_v25  ;;  %v897_v48 = vsub.f32 %v827_v42, %v896_v43  ;;  %v1292_v6 = vstv %s1291_s13  ;;  %s1814_s18 = sshll.u32 %s1926_s29, 4  ;;  %s1815_s18 = int_to_ptr.vmem [resolvable:$false] %s1814_s18 }
  0x78   : > { %v1586_v31 = vpack.c.bf16 %v404_v28, %v397_v27  ;;  %v376_v33 = vand.u32 4294901760, %v375_v29  ;;  %1606 = vmatprep.subr.bf16.mxu1 %v1923_v37  ;;  %p1812_p4 = pnand %p1811_p13, %p2250_p0  ;;  %s1816_s28 = scalar_lea.vmem %s1815_s18, 128 }
  0x79   : > { %v386_v34 = vand.u32 4294901760, %v385_v30  ;;  %v898_v49 = vand.u32 4294901760, %v897_v48  ;;  %p1817_p7 = scmp.lt.s32.totalorder %s2161_s12, %s1815_s18  ;;  %p1818_p3 = scmp.lt.s32.totalorder %s1816_s28, %s1810_s22 }
  0x7a   : > { %1587 = vmatprep.subr.bf16.mxu0 %v1586_v31  ;;  %1492 = vmatprep.mubr.f32.mxu1 %v376_v33  ;;  %p1813_p10 = pneg %p1812_p4 }
  0x7b   : > { %1589 = vmatpush3.bf16.msra.mxu0 %v1586_v31  ;;  %1493 = vmatmul.mubr.f32.vlgmr.msra.gmra.mrb[0].mxu1 %v386_v34  ;;  %v899_v53 = vsub.f32 %v897_v48, %v898_v49  ;;  %p1819_p8 = por %p1818_p3, %p1817_p7 }
  0x7c   : > { %1499 = vmatprep.subr.mxu0 %v411_v32  ;;  %1544 = vmatprep.mubr.msk.f32.mxu1 %vm1924_vm2, %v1925_v38 }
  0x7d   : > { %v900_v58 = vand.u32 4294901760, %v899_v53  ;;  %p1820_p9 = pnand %p1819_p8, %p1813_p10 }
  0x7f   : > { %1500 = vmatpush3.msra.mxu0 %v411_v32 }
  0x80   : > { %1502 = vmatmul.mubr.f32.vlgmr.msra.gmra.mrb[0].mxu0 %v382_v16  ;;  %1591 = vmatprep.subr.bf16.mxu0 %v1590_v35 }
  0x81   : > { %1593 = vmatpush3.bf16.msra.mxu0 %v1590_v35  ;;  %1510 = vmatprep.mubr.f32.mxu0 %v373_v19 }
  0x82   : > { %1508 = vmatprep.subr.mxu0 %v408_v15 }
  0x85   : > { %1509 = vmatpush3.msra.mxu0 %v408_v15 }
  0x86   : > { %1595 = vmatprep.subr.bf16.mxu0 %v1582_v11 }
  0x88   : > { %1511 = vmatmul.mubr.f32.vlgmr.msra.gmra.mrb[0].mxu0 %v383_v21 }
  0x89   : > { %1597 = vmatpush3.bf16.msra.mxu0 %v1582_v11  ;;  %1519 = vmatprep.mubr.f32.mxu0 %v374_v24 }
  0x8a   : > { %1517 = vmatprep.subr.mxu0 %v311_v8 }
  0x8d   : > { %1518 = vmatpush3.msra.mxu0 %v311_v8 }
  0x8e   : > { %1599 = vmatprep.subr.bf16.mxu0 %v1598_v36 }
  0x90   : > { %1520 = vmatmul.mubr.f32.vlgmr.msra.gmra.mrb[0].mxu0 %v384_v26 }
  0x91   : > { %1601 = vmatpush3.bf16.msra.mxu0 %v1598_v36  ;;  %1528 = vmatprep.mubr.f32.mxu0 %v372_v14 }
  0x92   : > { %1526 = vmatprep.subr.mxu0 %v409_v20 }
  0x95   : > { %1527 = vmatpush3.msra.mxu0 %v409_v20 }
  0x96   : > { %1603 = vmatprep.subr.bf16.mxu0 %v1582_v11 }
  0x98   : > { %1529 = vmatmul.mubr.f32.vlgmr.msra.gmra.mrb[0].mxu0 %v382_v16 }
  0x99   : > { %1605 = vmatpush3.bf16.msra.mxu0 %v1582_v11  ;;  %1537 = vmatprep.mubr.f32.mxu0 %v372_v14 }
  0x9a   : > { %1535 = vmatprep.subr.mxu0 %v311_v8 }
  0x9d   : > { %1536 = vmatpush3.msra.mxu0 %v311_v8 }
  0xa0   : > { %1538 = vmatmul.mubr.f32.vlgmr.msra.gmra.mrb[0].mxu0 %v382_v16 }
 0x14e   : > { %v1494_v39 = vpop.f32.mrb[0].mxu1 }
 0x14f   : > { %v378_v40 = vpop.f32.mrb[1].mxu1 }
 0x173   : > { %v1539_v44 = vpop.f32.mrb[0].mxu0 }
 0x174   : > { %v1624_v45 = vadd.f32 %v1539_v44, %v1494_v39  ;;  %v809_v46 = vpop.f32.mrb[1].mxu0 }
 0x175   : > { %v1625_v47 = vadd.f32 %v809_v46, %v378_v40 }
 0x176   : > { %821 = vst.msk [vmem:[#allocation2 + $0x8] sm:$0xff] %vm819_vm4, %v1624_v45 }
 0x177   : > { %820 = vst.msk [vmem:[#allocation2] sm:$0xff] %vm819_vm4, %v1625_v47 }
 0x17d   : > { %v824_v50 = vld [vmem:[#allocation2 + $0x8] sm:$0xff] }
 0x17e   : > { %v823_v51 = vld [vmem:[#allocation2] sm:$0xff]  ;;  %v833_v52 = vand.u32 4294901760, %v824_v50 }
 0x17f   : > { %v830_v54 = vand.u32 4294901760, %v823_v51 }
 0x180   : > { %v915_v55 = vsub.f32 %v824_v50, %v833_v52 }
 0x181   : > { %v1607_v56 = vpack.c.bf16 %v833_v52, %v830_v54  ;;  %v908_v57 = vsub.f32 %v823_v51, %v830_v54 }
 0x182   : > { %v916_v59 = vand.u32 4294901760, %v915_v55 }
 0x183   : > { %1608 = vmatpush3.bf16.msra.mxu1 %v1607_v56  ;;  %v909_v60 = vand.u32 4294901760, %v908_v57  ;;  %v1613_v2 = vpack.c.bf16 %v915_v55, %v908_v57 }
 0x184   : > { %1609 = vmatprep.subr.bf16.mxu1 %v1923_v37  ;;  %v917_v61 = vsub.f32 %v915_v55, %v916_v59 }
 0x185   : > { %v910_v62 = vsub.f32 %v908_v57, %v909_v60  ;;  %v1619_v3 = vpack.c.bf16 %v916_v59, %v909_v60 }
 0x186   : > { %1545 = vmatmul.mubr.f32.vlgmr.msra.gmra.mrb[2].mxu1 %v900_v58  ;;  %v918_v63 = vand.u32 4294901760, %v917_v61 }
 0x187   : > { %v911_v0 = vand.u32 4294901760, %v910_v62  ;;  %1551 = vmatprep.mubr.msk.f32.mxu1 %vm1924_vm2, %v1925_v38 }
 0x189   : > { %v1610_v1 = vpack.c.bf16 %v918_v63, %v911_v0 }
 0x18b   : > { %1611 = vmatpush3.bf16.msra.mxu1 %v1610_v1 }
 0x18c   : > { %1612 = vmatprep.subr.bf16.mxu1 %v1923_v37 }
 0x18e   : > { %1552 = vmatmul.mubr.f32.vlgmr.msra.gmra.mrb[2].mxu1 %v896_v43 }
 0x18f   : > { %1614 = vmatpush3.bf16.msra.mxu1 %v1613_v2  ;;  %1558 = vmatprep.mubr.msk.f32.mxu1 %vm1924_vm2, %v1925_v38 }
 0x190   : > { %1615 = vmatprep.subr.bf16.mxu1 %v1923_v37 }
 0x196   : > { %1559 = vmatmul.mubr.f32.vlgmr.msra.gmra.mrb[2].mxu1 %v897_v48 }
 0x197   : > { %1617 = vmatpush3.bf16.msra.mxu1 %v1607_v56  ;;  %1565 = vmatprep.mubr.msk.f32.mxu1 %vm1924_vm2, %v1925_v38 }
 0x198   : > { %1618 = vmatprep.subr.bf16.mxu1 %v1923_v37 }
 0x19e   : > { %1566 = vmatmul.mubr.f32.vlgmr.msra.gmra.mrb[2].mxu1 %v898_v49 }
 0x19f   : > { %1620 = vmatpush3.bf16.msra.mxu1 %v1619_v3  ;;  %1572 = vmatprep.mubr.msk.f32.mxu1 %vm1924_vm2, %v1925_v38 }
 0x1a0   : > { %1621 = vmatprep.subr.bf16.mxu1 %v1923_v37 }
 0x1a6   : > { %1573 = vmatmul.mubr.f32.vlgmr.msra.gmra.mrb[2].mxu1 %v896_v43 }
 0x1a7   : > { %1623 = vmatpush3.bf16.msra.mxu1 %v1607_v56  ;;  %1579 = vmatprep.mubr.msk.f32.mxu1 %vm1924_vm2, %v1925_v38 }
 0x1ae   : > { %1580 = vmatmul.mubr.f32.vlgmr.msra.gmra.mrb[2].mxu1 %v896_v43 }
 0x281   : > { %v1284_v5 = vpop.f32.mrb[2].mxu1 }
 0x282   : > { %v1290_v7 = vmul.f32 %v1289_v4, %v1284_v5  ;;  %v1581_v8 = vpop.f32.mrb[3].mxu1 }
 0x284   : > { %v1293_v9 = vadd.f32 %v1292_v6, %v1290_v7 }
 0x286   : > { %1295 = vst.msk [vmem:[%s287_s23] sm:$0xf] %vm1294_vm5, %v1293_v9 }
 0x287   : > { %1823 = shalt.err (!%p1820_p9)
}
 0x288   : > { %s1824_s0 = scalar_lea.hbm %s2159_s15, 64  ;;  %s1828_s17 = scalar_lea.hbm %s2218_s5, 384 }
 0x289   : > { %p1825_p2 = scmp.ne.s32.totalorder %s2159_s15, %s1824_s0  ;;  %p1829_p1 = scmp.lt.u32.totalorder %s2159_s15, %s2218_s5 }
 0x28a   : > { %p1830_p6 = scmp.lt.u32.totalorder %s1828_s17, %s1824_s0  ;;  %p1832_p13 = scmp.lt.u32.totalorder %s1824_s0, %s2159_s15 }
 0x28b   : > { %p1826_p11 = pnand %p1825_p2, %p2250_p0 }
 0x28c   : > { %p1831_p12 = por %p1830_p6, %p1829_p1 }
 0x28d   : > { %p1827_p5 = pneg %p1826_p11 }
 0x28e   : > { %p1833_p4 = por %p1832_p13, %p1831_p12 }
 0x290   : > { %p1834_p10 = pnand %p1833_p4, %p1827_p5 }
 0x292   : > { %1837 = shalt.err (!%p1834_p10)
}
 0x293   : > { %1656 = dma.vmem_to_hbm [thread:$0]  (%p2250_p0), %s2161_s12, 64, %s2159_s15, %s1297_s21  }
 0x294 PF: > { %s2251_s27 = sld [smem:[#allocation15_spill]]  ;;  %s2252_s9 = sld [smem:[#allocation17_spill]] }
 0x295   : > { %p1678_p7 = scmp.ge.s32.totalorder %s1916_s25, 2 }
 0x29a   : > { %s1324_s14 = sand.u32 1, %s2251_s27   ;;  %p2253_p3 = scmp.ne.s32.totalorder %s2252_s9, 0 }
 0x29b   : > { %s1325_s26 = scalar_lea.sflag [#allocation5], %s1324_s14 }
 0x29c   : > { %p1670_p8 = pnand %p1678_p7, %p2253_p3 }
 0x29e   : > { %1883 = dma.done.wait (!%p1670_p8), %s1325_s26, 64  }
 0x29f   : > { %1885 = vsyncadd (!%p1670_p8), %s1325_s26, 4294967232  ;;  %s23_s25 = sadd.s32 1, %s1916_s25   ;;  %s2254_s21 = sld [smem:[#allocation16_spill]] }
 0x2a0   : > { %p20_p9 = scmp.ge.s32.totalorder %s23_s25, 8   ;;  %s2255_s23 = sld [smem:[#allocation18_spill]] }
 0x2a1   : > { %s2256_s18 = smov %s1892_s19  ;;  %s2257_s19 = smov %s1896_s20 }
 0x2a2   : > { %s2258_s20 = smov %s2084_s30  ;;  %s2259_s22 = smov %s1912_s24 }
 0x2a3   : > { %s2260_s24 = smov %s2266_s11  ;;  %22 = sbr.rel (!%p20_p9) target bundleno = 12 (0xc), region = 94 }
 0x2aa   :  { %1330 = vsyncpa [#allocation4], 1 }
 0x2ab   :  { %1332 = vsyncpa [#allocation4 + $0x1], 1 }
 0x2ac   :  { %1333 = vsyncpa [#allocation5], 1 }
 0x2ad   :  { %1335 = vsyncpa [#allocation5 + $0x1], 1 }
 0x2ae   :  { %1336 = vsyncpa [#allocation6], 1 }
 0x2af   :  { %1338 = vsyncpa [#allocation6 + $0x1], 1 }
 0x2b0   :  { %1339 = vsyncpa [#allocation8], 1 }

</bundles_post_ra>
